<compile_context>
chip_gen: v6e
topology: v6e:2x2x1
jax: 0.10.0
libtpu: 0.0.40
codegen_flags: <defaults>
</compile_context>

<pallas_src>
import functools
import math

import jax
import jax.numpy as jnp
from jax.experimental import pallas as pl
from jax.experimental.pallas import tpu as pltpu

_HALF_LOG_2PI = 0.5 * math.log(2.0 * math.pi)


def _policy_kernel(x_ref, w0_ref, b0_ref, w1_ref, b1_ref, w2_ref, b2_ref,
                   log_std_ref, ea_ref, out_ref, *, act_dim):
    # --- mu MLP: bf16 MXU operands, f32 accumulation, f32 element-wise math ---
    x = x_ref[...].astype(jnp.bfloat16)        # cast at the MXU operand (hides under matmul)
    h = jnp.tanh(
        jnp.dot(x, w0_ref[...], preferred_element_type=jnp.float32) + b0_ref[...])
    h = jnp.tanh(
        jnp.dot(h.astype(jnp.bfloat16), w1_ref[...],
                preferred_element_type=jnp.float32) + b1_ref[...])
    mu = jnp.dot(h.astype(jnp.bfloat16), w2_ref[...],
                 preferred_element_type=jnp.float32) + b2_ref[...]

    log_std = log_std_ref[...]                 # (1, act_dim), broadcasts over the batch tile
    std = jnp.exp(log_std)                     # EUP
    inv_std = jnp.exp(-log_std)                # EUP; removes per-element divides
    log_const = -log_std - _HALF_LOG_2PI       # folded normalization constant

    # merged side-operand: [ a | eps ]
    a = ea_ref[:, :act_dim]
    eps = ea_ref[:, act_dim:]

    # reparameterized sample: pi ~ Normal(mu, std)
    pi = mu + std * eps

    # log N(pi | mu, std): (pi - mu)/std == eps exactly -> independent of mu, overlaps matmuls
    logp_pi = jnp.sum(-0.5 * eps * eps + log_const, axis=1, keepdims=True)
    # log N(a | mu, std)
    z = (a - mu) * inv_std
    logp_a = jnp.sum(-0.5 * z * z + log_const, axis=1, keepdims=True)

    # single packed output slab [pi(act_dim) | logp(a) | logp(pi)] -> one output DMA stream
    out_ref[:, :act_dim] = pi
    out_ref[:, act_dim:act_dim + 1] = logp_a
    out_ref[:, act_dim + 1:act_dim + 2] = logp_pi


def _round_up(n, m):
    return ((n + m - 1) // m) * m


def gaussian_policy_forward(x, params, log_std, eps, a, *, tm=2048):
    """Returns (pi, logp, logp_pi) matching GaussianPolicy.forward(x, a) semantics.

    `eps` is standard-normal noise (same shape as `a`) supplied by the caller; the kernel
    applies pi = mu + exp(log_std) * eps, distributionally identical to Normal.sample().
    """
    (w0, b0), (w1, b1), (w2, b2) = params
    batch, in_features = x.shape
    h1 = w0.shape[1]
    h2 = w1.shape[1]
    act_dim = w2.shape[1]

    # Weights are tiny (<20 KiB) and VMEM-resident: cast once here, stream x as f32.
    w0_bf = w0.astype(jnp.bfloat16)
    w1_bf = w1.astype(jnp.bfloat16)
    w2_bf = w2.astype(jnp.bfloat16)

    # One streamed side-operand instead of two lane-sparse ones: [ a | eps ].
    ea = jnp.concatenate([a, eps], axis=1)

    # Tile choice: as large as possible (per-step overhead ~0.35us dominates this tiny
    # compute), but keep >=4 grid steps when the batch allows so v7x megacore gets both
    # TensorCores busy and each core still has >=2 steps for DMA/compute overlap.
    tm_eff = min(tm, _round_up(pl.cdiv(batch, 4), 8))
    tm_eff = max(tm_eff, 8)
    grid = (pl.cdiv(batch, tm_eff),)           # ragged tail handled by Pallas masking

    out_cols = act_dim + 2

    def stream(feat):
        # batch-tiled operand: new block each grid step (double-buffered DMA)
        return pl.BlockSpec((tm_eff, feat), lambda i: (i, 0))

    def resident(arr):
        # full array, same block every step -> stays VMEM-resident
        return pl.BlockSpec(arr.shape, lambda i: (0, 0))

    in_specs = [
        stream(in_features),                   # x (f32, cast to bf16 in-kernel)
        resident(w0_bf), resident(b0),
        resident(w1_bf), resident(b1),
        resident(w2_bf), resident(b2),
        resident(log_std),
        stream(2 * act_dim),                   # [a | eps]
    ]
    out_spec = stream(out_cols)
    out_shape = jax.ShapeDtypeStruct((batch, out_cols), jnp.float32)

    flops = 2 * batch * (in_features * h1 + h1 * h2 + h2 * act_dim)
    transcendentals = batch * (h1 + h2)        # two tanh layers
    streamed_bytes = 4 * batch * (in_features + 3 * act_dim + 2)
    resident_bytes = 2 * (in_features * h1 + h1 * h2 + h2 * act_dim) \
        + 4 * (h1 + h2 + 2 * act_dim)
    cost = pl.CostEstimate(flops=flops, transcendentals=transcendentals,
                           bytes_accessed=streamed_bytes + resident_bytes)

    out = pl.pallas_call(
        functools.partial(_policy_kernel, act_dim=act_dim),
        grid=grid,
        in_specs=in_specs,
        out_specs=out_spec,
        out_shape=out_shape,
        compiler_params=pltpu.CompilerParams(
            dimension_semantics=("parallel",)),
        cost_estimate=cost,
    )(x, w0_bf, b0, w1_bf, b1, w2_bf, b2, log_std, ea)

    pi = out[:, :act_dim]
    logp = out[:, act_dim]
    logp_pi = out[:, act_dim + 1]
    return pi, logp, logp_pi


def init_params(key, in_features, hidden_sizes, act_dim):
    """Deterministic PyTorch-Linear-style init (uniform +/- 1/sqrt(fan_in))."""
    sizes = [in_features] + list(hidden_sizes) + [act_dim]
    params = []
    for i in range(len(sizes) - 1):
        key, kw, kb = jax.random.split(key, 3)
        bound = 1.0 / math.sqrt(sizes[i])
        w = jax.random.uniform(kw, (sizes[i], sizes[i + 1]), jnp.float32,
                               -bound, bound)
        b = jax.random.uniform(kb, (1, sizes[i + 1]), jnp.float32, -bound, bound)
        params.append((w, b))
    log_std = -0.5 * jnp.ones((1, act_dim), dtype=jnp.float32)
    return params, log_std


if __name__ == "__main__":
    key = jax.random.PRNGKey(0)

    batch = 512              # -> tm=128, 4 grid steps: exercises pipelining + megacore split
    in_features = 32
    hidden_sizes = (64, 64)
    act_dim = 4

    k_params, k_x, k_eps, k_a = jax.random.split(key, 4)
    params, log_std = init_params(k_params, in_features, hidden_sizes, act_dim)

    x = jax.random.normal(k_x, (batch, in_features), jnp.float32)
    eps = jax.random.normal(k_eps, (batch, act_dim), jnp.float32)  # N(0,1) noise
    a = jax.random.normal(k_a, (batch, act_dim), jnp.float32)      # given actions

    fwd = jax.jit(functools.partial(gaussian_policy_forward, tm=2048))
    pi, logp, logp_pi = fwd(x, params, log_std, eps, a)
    jax.block_until_ready((pi, logp, logp_pi))

    # pure-JAX reference using the same bf16-matmul / f32-elementwise recipe
    def ref_forward(x, params, log_std, eps, a):
        (w0, b0), (w1, b1), (w2, b2) = params
        h = jnp.tanh(jnp.dot(x.astype(jnp.bfloat16), w0.astype(jnp.bfloat16),
                             preferred_element_type=jnp.float32) + b0)
        h = jnp.tanh(jnp.dot(h.astype(jnp.bfloat16), w1.astype(jnp.bfloat16),
                             preferred_element_type=jnp.float32) + b1)
        mu = jnp.dot(h.astype(jnp.bfloat16), w2.astype(jnp.bfloat16),
                     preferred_element_type=jnp.float32) + b2
        std = jnp.exp(log_std)
        pi_r = mu + std * eps

        def lp(v):
            z = (v - mu) / std
            return jnp.sum(-0.5 * z * z - log_std - 0.5 * jnp.log(2.0 * jnp.pi),
                           axis=1)

        return pi_r, lp(a), lp(pi_r)

    pi_r, logp_r, logp_pi_r = ref_forward(x, params, log_std, eps, a)
    assert pi.shape == (batch, act_dim)
    assert logp.shape == (batch,)
    assert logp_pi.shape == (batch,)
    assert jnp.allclose(pi, pi_r, atol=5e-3)
    assert jnp.allclose(logp, logp_r, atol=5e-3)
    assert jnp.allclose(logp_pi, logp_pi_r, atol=5e-3)

    print("KERNEL_OK")
</pallas_src>

<mosaic_0001>
module attributes {stable_mosaic.version = 11 : i64} {
  func.func @_policy_kernel(%arg0: i32, %arg1: memref<128x32xf32, #tpu.memory_space<vmem>>, %arg2: memref<32x64xbf16, #tpu.memory_space<vmem>>, %arg3: memref<1x64xf32, #tpu.memory_space<vmem>>, %arg4: memref<64x64xbf16, #tpu.memory_space<vmem>>, %arg5: memref<1x64xf32, #tpu.memory_space<vmem>>, %arg6: memref<64x4xbf16, #tpu.memory_space<vmem>>, %arg7: memref<1x4xf32, #tpu.memory_space<vmem>>, %arg8: memref<1x4xf32, #tpu.memory_space<vmem>>, %arg9: memref<128x8xf32, #tpu.memory_space<vmem>>, %arg10: memref<128x6xf32, #tpu.memory_space<vmem>>) attributes {dimension_semantics = [#tpu.dimension_semantics<parallel>], iteration_bounds = array<i64: 4>, scalar_prefetch = 0 : i64, scratch_operands = 0 : i64, tpu.core_type = #tpu.core_type<tc>, window_params = [{transform_indices = @transform_0, window_bounds = array<i64: 128, 32>}, {pipeline_mode = #tpu.pipeline_mode<synchronous>, transform_indices = @transform_1, window_bounds = array<i64: 32, 64>}, {pipeline_mode = #tpu.pipeline_mode<synchronous>, transform_indices = @transform_2, window_bounds = array<i64: 1, 64>}, {pipeline_mode = #tpu.pipeline_mode<synchronous>, transform_indices = @transform_3, window_bounds = array<i64: 64, 64>}, {pipeline_mode = #tpu.pipeline_mode<synchronous>, transform_indices = @transform_4, window_bounds = array<i64: 1, 64>}, {pipeline_mode = #tpu.pipeline_mode<synchronous>, transform_indices = @transform_5, window_bounds = array<i64: 64, 4>}, {pipeline_mode = #tpu.pipeline_mode<synchronous>, transform_indices = @transform_6, window_bounds = array<i64: 1, 4>}, {pipeline_mode = #tpu.pipeline_mode<synchronous>, transform_indices = @transform_7, window_bounds = array<i64: 1, 4>}, {transform_indices = @transform_8, window_bounds = array<i64: 128, 8>}, {transform_indices = @transform_9, window_bounds = array<i64: 128, 6>}]} {
    %c0 = arith.constant 0 : index
    %c0_0 = arith.constant 0 : index
    %0 = vector.load %arg1[%c0, %c0_0] : memref<128x32xf32, #tpu.memory_space<vmem>>, vector<128x32xf32>
    %1 = arith.truncf %0 : vector<128x32xf32> to vector<128x32xbf16>
    %c0_1 = arith.constant 0 : index
    %c0_2 = arith.constant 0 : index
    %2 = vector.load %arg2[%c0_1, %c0_2] : memref<32x64xbf16, #tpu.memory_space<vmem>>, vector<32x64xbf16>
    %cst = arith.constant dense<0.000000e+00> : vector<128x64xf32>
    %3 = tpu.matmul %1, %2, %cst {dimension_numbers = #tpu.dot_dimension_numbers<[1], [0], [0], [1], [0, 0, 1, 1], [], []>} : vector<128x32xbf16>, vector<32x64xbf16>, vector<128x64xf32> -> vector<128x64xf32>
    %c0_3 = arith.constant 0 : index
    %c0_4 = arith.constant 0 : index
    %4 = vector.load %arg3[%c0_3, %c0_4] : memref<1x64xf32, #tpu.memory_space<vmem>>, vector<1x64xf32>
    %5 = vector.broadcast %4 : vector<1x64xf32> to vector<128x64xf32>
    %6 = arith.addf %3, %5 : vector<128x64xf32>
    %7 = math.tanh %6 : vector<128x64xf32>
    %8 = arith.truncf %7 : vector<128x64xf32> to vector<128x64xbf16>
    %c0_5 = arith.constant 0 : index
    %c0_6 = arith.constant 0 : index
    %9 = vector.load %arg4[%c0_5, %c0_6] : memref<64x64xbf16, #tpu.memory_space<vmem>>, vector<64x64xbf16>
    %cst_7 = arith.constant dense<0.000000e+00> : vector<128x64xf32>
    %10 = tpu.matmul %8, %9, %cst_7 {dimension_numbers = #tpu.dot_dimension_numbers<[1], [0], [0], [1], [0, 0, 1, 1], [], []>} : vector<128x64xbf16>, vector<64x64xbf16>, vector<128x64xf32> -> vector<128x64xf32>
    %c0_8 = arith.constant 0 : index
    %c0_9 = arith.constant 0 : index
    %11 = vector.load %arg5[%c0_8, %c0_9] : memref<1x64xf32, #tpu.memory_space<vmem>>, vector<1x64xf32>
    %12 = vector.broadcast %11 : vector<1x64xf32> to vector<128x64xf32>
    %13 = arith.addf %10, %12 : vector<128x64xf32>
    %14 = math.tanh %13 : vector<128x64xf32>
    %15 = arith.truncf %14 : vector<128x64xf32> to vector<128x64xbf16>
    %c0_10 = arith.constant 0 : index
    %c0_11 = arith.constant 0 : index
    %16 = vector.load %arg6[%c0_10, %c0_11] : memref<64x4xbf16, #tpu.memory_space<vmem>>, vector<64x4xbf16>
    %cst_12 = arith.constant dense<0.000000e+00> : vector<128x4xf32>
    %17 = tpu.matmul %15, %16, %cst_12 {dimension_numbers = #tpu.dot_dimension_numbers<[1], [0], [0], [1], [0, 0, 1, 1], [], []>} : vector<128x64xbf16>, vector<64x4xbf16>, vector<128x4xf32> -> vector<128x4xf32>
    %c0_13 = arith.constant 0 : index
    %c0_14 = arith.constant 0 : index
    %18 = vector.load %arg7[%c0_13, %c0_14] : memref<1x4xf32, #tpu.memory_space<vmem>>, vector<1x4xf32>
    %19 = vector.broadcast %18 : vector<1x4xf32> to vector<128x4xf32>
    %20 = arith.addf %17, %19 : vector<128x4xf32>
    %c0_15 = arith.constant 0 : index
    %c0_16 = arith.constant 0 : index
    %21 = vector.load %arg8[%c0_15, %c0_16] : memref<1x4xf32, #tpu.memory_space<vmem>>, vector<1x4xf32>
    %22 = math.exp %21 : vector<1x4xf32>
    %cst_17 = arith.constant 0.000000e+00 : f32
    %23 = vector.broadcast %cst_17 : f32 to vector<1x4xf32>
    %24 = arith.subf %23, %21 : vector<1x4xf32>
    %25 = math.exp %24 : vector<1x4xf32>
    %cst_18 = arith.constant 0.000000e+00 : f32
    %26 = vector.broadcast %cst_18 : f32 to vector<1x4xf32>
    %27 = arith.subf %26, %21 : vector<1x4xf32>
    %cst_19 = arith.constant 0.918938517 : f32
    %28 = vector.broadcast %cst_19 : f32 to vector<1x4xf32>
    %29 = arith.subf %27, %28 : vector<1x4xf32>
    %c0_20 = arith.constant 0 : index
    %c0_21 = arith.constant 0 : index
    %30 = vector.load %arg9[%c0_20, %c0_21] : memref<128x8xf32, #tpu.memory_space<vmem>>, vector<128x4xf32>
    %c0_22 = arith.constant 0 : index
    %c4 = arith.constant 4 : index
    %31 = vector.load %arg9[%c0_22, %c4] : memref<128x8xf32, #tpu.memory_space<vmem>>, vector<128x4xf32>
    %32 = vector.broadcast %22 : vector<1x4xf32> to vector<128x4xf32>
    %33 = arith.mulf %32, %31 : vector<128x4xf32>
    %34 = arith.addf %20, %33 : vector<128x4xf32>
    %cst_23 = arith.constant -5.000000e-01 : f32
    %35 = vector.broadcast %cst_23 : f32 to vector<128x4xf32>
    %36 = arith.mulf %35, %31 : vector<128x4xf32>
    %37 = arith.mulf %36, %31 : vector<128x4xf32>
    %38 = vector.broadcast %29 : vector<1x4xf32> to vector<128x4xf32>
    %39 = arith.addf %37, %38 : vector<128x4xf32>
    %cst_24 = arith.constant dense<0.000000e+00> : vector<128xf32>
    %40 = vector.multi_reduction <add>, %39, %cst_24 [1] : vector<128x4xf32> to vector<128xf32>
    %41 = vector.shape_cast %40 : vector<128xf32> to vector<128x1xf32>
    %42 = arith.subf %30, %20 : vector<128x4xf32>
    %43 = vector.broadcast %25 : vector<1x4xf32> to vector<128x4xf32>
    %44 = arith.mulf %42, %43 : vector<128x4xf32>
    %cst_25 = arith.constant -5.000000e-01 : f32
    %45 = vector.broadcast %cst_25 : f32 to vector<128x4xf32>
    %46 = arith.mulf %45, %44 : vector<128x4xf32>
    %47 = arith.mulf %46, %44 : vector<128x4xf32>
    %48 = vector.broadcast %29 : vector<1x4xf32> to vector<128x4xf32>
    %49 = arith.addf %47, %48 : vector<128x4xf32>
    %cst_26 = arith.constant dense<0.000000e+00> : vector<128xf32>
    %50 = vector.multi_reduction <add>, %49, %cst_26 [1] : vector<128x4xf32> to vector<128xf32>
    %51 = vector.shape_cast %50 : vector<128xf32> to vector<128x1xf32>
    %c0_27 = arith.constant 0 : index
    %c0_28 = arith.constant 0 : index
    %52 = vector.load %arg10[%c0_27, %c0_28] : memref<128x6xf32, #tpu.memory_space<vmem>>, vector<128x4xf32>
    tpu.vector_store %arg10[%c0_27, %c0_28], %34 {strides = array<i32>} : memref<128x6xf32, #tpu.memory_space<vmem>>, vector<128x4xf32>,
    %c0_29 = arith.constant 0 : index
    %c4_30 = arith.constant 4 : index
    %53 = vector.load %arg10[%c0_29, %c4_30] : memref<128x6xf32, #tpu.memory_space<vmem>>, vector<128x1xf32>
    tpu.vector_store %arg10[%c0_29, %c4_30], %51 {strides = array<i32>} : memref<128x6xf32, #tpu.memory_space<vmem>>, vector<128x1xf32>,
    %c0_31 = arith.constant 0 : index
    %c5 = arith.constant 5 : index
    %54 = vector.load %arg10[%c0_31, %c5] : memref<128x6xf32, #tpu.memory_space<vmem>>, vector<128x1xf32>
    tpu.vector_store %arg10[%c0_31, %c5], %41 {strides = array<i32>} : memref<128x6xf32, #tpu.memory_space<vmem>>, vector<128x1xf32>,
    return
  }
  func.func @transform_0(%arg0: i32) -> (i32, i32) {
    %c0_i32 = arith.constant 0 : i32
    %c0_i32_0 = arith.constant 0 : i32
    return %arg0, %c0_i32 : i32, i32
  }
  func.func @transform_1(%arg0: i32) -> (i32, i32) {
    %c0_i32 = arith.constant 0 : i32
    %c0_i32_0 = arith.constant 0 : i32
    %c0_i32_1 = arith.constant 0 : i32
    return %c0_i32, %c0_i32_0 : i32, i32
  }
  func.func @transform_2(%arg0: i32) -> (i32, i32) {
    %c0_i32 = arith.constant 0 : i32
    %c0_i32_0 = arith.constant 0 : i32
    %c0_i32_1 = arith.constant 0 : i32
    return %c0_i32, %c0_i32_0 : i32, i32
  }
  func.func @transform_3(%arg0: i32) -> (i32, i32) {
    %c0_i32 = arith.constant 0 : i32
    %c0_i32_0 = arith.constant 0 : i32
    %c0_i32_1 = arith.constant 0 : i32
    return %c0_i32, %c0_i32_0 : i32, i32
  }
  func.func @transform_4(%arg0: i32) -> (i32, i32) {
    %c0_i32 = arith.constant 0 : i32
    %c0_i32_0 = arith.constant 0 : i32
    %c0_i32_1 = arith.constant 0 : i32
    return %c0_i32, %c0_i32_0 : i32, i32
  }
  func.func @transform_5(%arg0: i32) -> (i32, i32) {
    %c0_i32 = arith.constant 0 : i32
    %c0_i32_0 = arith.constant 0 : i32
    %c0_i32_1 = arith.constant 0 : i32
    return %c0_i32, %c0_i32_0 : i32, i32
  }
  func.func @transform_6(%arg0: i32) -> (i32, i32) {
    %c0_i32 = arith.constant 0 : i32
    %c0_i32_0 = arith.constant 0 : i32
    %c0_i32_1 = arith.constant 0 : i32
    return %c0_i32, %c0_i32_0 : i32, i32
  }
  func.func @transform_7(%arg0: i32) -> (i32, i32) {
    %c0_i32 = arith.constant 0 : i32
    %c0_i32_0 = arith.constant 0 : i32
    %c0_i32_1 = arith.constant 0 : i32
    return %c0_i32, %c0_i32_0 : i32, i32
  }
  func.func @transform_8(%arg0: i32) -> (i32, i32) {
    %c0_i32 = arith.constant 0 : i32
    %c0_i32_0 = arith.constant 0 : i32
    return %arg0, %c0_i32 : i32, i32
  }
  func.func @transform_9(%arg0: i32) -> (i32, i32) {
    %c0_i32 = arith.constant 0 : i32
    %c0_i32_0 = arith.constant 0 : i32
    return %arg0, %c0_i32 : i32, i32
  }
}

</mosaic_0001>

<bundles_post_ra>
// kernel: gaussian_policy_forward.1
= control target key start
LH: loop header
LB: loop body
LE: loop exit
PB: predicated region body
PF: predicated region fallthrough
CT: control target
= control target key end

     0   :  { %s1749_s30 = smov 0   ;;  %s2307_s0 = inlined_call_operand.vmem [shape: f32[512,32], index: 0, kind: input, shape index: {}]   ;;  %s2308_s1 = inlined_call_operand.vmem [shape: bf16[32,64], index: 1, kind: input, shape index: {}]   ;;  %s2309_s2 = inlined_call_operand.vmem [shape: f32[1,64], index: 2, kind: input, shape index: {}]   ;;  %s2310_s3 = inlined_call_operand.vmem [shape: bf16[64,64], index: 3, kind: input, shape index: {}]   ;;  %s2311_s4 = inlined_call_operand.vmem [shape: f32[1,64], index: 4, kind: input, shape index: {}]   ;;  %s2312_s5 = inlined_call_operand.vmem [shape: bf16[64,4], index: 5, kind: input, shape index: {}]   ;;  %s2313_s6 = inlined_call_operand.vmem [shape: f32[1,4], index: 6, kind: input, shape index: {}]   ;;  %s2314_s7 = inlined_call_operand.vmem [shape: f32[1,4], index: 7, kind: input, shape index: {}]   ;;  %s2315_s8 = inlined_call_operand.vmem [shape: f32[512,8], index: 8, kind: input, shape index: {}]   ;;  %s2316_s9 = inlined_call_operand.vmem [shape: f32[512,6], index: 9, kind: output, shape index: {}]  }
   0x1 LB: > { %s1444_s10 = sadd.s32 4294967295, %s1695_s30   ;;  %p1448_p0 = scmp.ge.s32.totalorder %s1695_s30, 1  ;;  %s1695_s30 = sphi %s1749_s30, %s19_s30  }
   0x2   : > { %p299_p1 = scmp.lt.s32.totalorder %s1695_s30, 5 }
   0x4   : > { %p300_p2 = pnand %p1448_p0, %p299_p1 }
   0x5   : > { %s1449_s13 = sshll.u32 (!%p300_p2), %s1444_s10, 4  ;;  %s1697_s10 = smov (!%p300_p2), 4  }
   0x6   : > { %303 = sbr.rel (%p300_p2) target bundleno = 841 (0x349), region = 56  ;;  %p341_p3 = scmp.lt.s32.totalorder (!%p300_p2), %s1449_s13, 63 }
   0x7   : > { %s1698_s25 = smov (!%p300_p2), 124  }
   0xb   : > { %v1611_v0 = vld [vmem:[%s2308_s1 + $0x8] sm:$0xff]   ;;  %v1612_v1 = vld [vmem:[%s2308_s1] sm:$0xff]   ;;  %s2318_s13 = smov (!%p341_p3, %s1449_s13), 63  ;;  %vm406_vm0 = vcmask 261120   ;;  %v1613_v26 = vld [vmem:[%s2310_s3 + $0x18] sm:$0xff]   ;;  %v921_v31 = vlaneseq  ;;  %vm591_vm1 = vcmask 523264  }
   0xc   : > { %1529 = vmatprep.subr.bf16.mxu0 %v1611_v0  ;;  %1597 = vmatprep.subr.bf16.mxu1 %v1611_v0  ;;  %s1763_s16 = sshll.u32 %s2318_s13, 3  ;;  %v1614_v27 = vld [vmem:[%s2310_s3 + $0x10] sm:$0xff]   ;;  %v1615_v28 = vld [vmem:[%s2310_s3 + $0x8] sm:$0xff]   ;;  %v1616_v29 = vld [vmem:[%s2310_s3] sm:$0xff]   ;;  %vm1143_vm2 = vcmask 31744   ;;  %vm1342_vm3 = vcmask 39968  }
   0xd   : > { %1530 = vmatpush3.bf16.msra.mxu0 %v1611_v0  ;;  %1599 = vmatpush3.bf16.msra.mxu1 %v1611_v0  ;;  %s1769_s19 = scalar_lea.vmem %s2307_s0, %s1763_s16  ;;  %v1810_v30 = vld [vmem:[%s2314_s7] sm:$0x1]  ;;  %v922_v33 = vshrl.u32 %v921_v31, 7  ;;  %v1617_v31 = vld [vmem:[%s2312_s5 + $0x18] sm:$0xff]   ;;  %s1848_s24 = scalar_lea.vmem %s2315_s8, %s1763_s16  ;;  %vm1359_vm4 = vcmask 48168  }
   0xe   : > { %1531 = vmatprep.subr.bf16.mxu0 %v1612_v1  ;;  %1598 = vmatprep.subr.bf16.mxu1 %v1612_v1  ;;  %v359_v2 = vld [vmem:[%s1769_s19] sm:$0xff]  ;;  %v360_v3 = vld [vmem:[%s1769_s19 + $0x8] sm:$0xff]  ;;  %v361_v4 = vld [vmem:[%s1769_s19 + $0x10] sm:$0xff]  ;;  %v900_v32 = vsub.f32 0.0, %v1810_v30  ;;  %s2074_s12 = scalar_lea.vmem %s2316_s9, %s1763_s16 }
   0xf   : > { %v375_v5 = vpack.c.bf16 %v360_v3, %v359_v2  ;;  %v362_v6 = vld [vmem:[%s1769_s19 + $0x18] sm:$0xff]  ;;  %v363_v7 = vld [vmem:[%s1769_s19 + $0x20] sm:$0xff]  ;;  %v364_v8 = vld [vmem:[%s1769_s19 + $0x28] sm:$0xff]  ;;  %v1815_v35 = vsub.s32 0, %v922_v33 }
  0x10   : > { %v376_v9 = vpack.c.bf16 %v362_v6, %v361_v4  ;;  %v377_v10 = vpack.c.bf16 %v364_v8, %v363_v7  ;;  %v367_v11 = vld [vmem:[%s1769_s19 + $0x40] sm:$0xff]  ;;  %v368_v12 = vld [vmem:[%s1769_s19 + $0x48] sm:$0xff]  ;;  %v369_v13 = vld [vmem:[%s1769_s19 + $0x50] sm:$0xff]  ;;  %v1492_v34 = vadd.f32 -0.9189385, %v900_v32 }
  0x11   : > { %1532 = vmatpush3.bf16.msra.mxu0 %v1612_v1  ;;  %1600 = vmatpush3.bf16.msra.mxu1 %v1612_v1  ;;  %v370_v14 = vld [vmem:[%s1769_s19 + $0x58] sm:$0xff]  ;;  %v365_v15 = vld [vmem:[%s1769_s19 + $0x30] sm:$0xff]  ;;  %v379_v16 = vpack.c.bf16 %v368_v12, %v367_v11  ;;  %v371_v18 = vld [vmem:[%s1769_s19 + $0x60] sm:$0xff] }
  0x12   : > { %1533 = vmatprep.mubr.msk.bf16.mxu0 %vm406_vm0, %v375_v5  ;;  %v380_v17 = vpack.c.bf16 %v370_v14, %v369_v13  ;;  %v372_v19 = vld [vmem:[%s1769_s19 + $0x68] sm:$0xff]  ;;  %v366_v20 = vld [vmem:[%s1769_s19 + $0x38] sm:$0xff]  ;;  %v373_v23 = vld [vmem:[%s1769_s19 + $0x70] sm:$0xff]  ;;  %1549 = vmatprep.subr.bf16.mxu1 %v1613_v26  ;;  %v1818_v36 = vrot.slane %v1492_v34, %v1815_v35 }
  0x13   : > { %v381_v21 = vpack.c.bf16 %v372_v19, %v371_v18  ;;  %1541 = vmatprep.mubr.msk.bf16.mxu1 %vm406_vm0, %v379_v16  ;;  %v378_v22 = vpack.c.bf16 %v366_v20, %v365_v15  ;;  %v374_v24 = vld [vmem:[%s1769_s19 + $0x78] sm:$0xff]  ;;  %v1455_v38 = vld [vmem:[%s2309_s2] ss:$0 sm:$0xff]  ;;  %1573 = vmatprep.subr.bf16.mxu0 %v1617_v31  ;;  %v1618_v33 = vld [vmem:[%s2312_s5 + $0x10] sm:$0xff]  }
  0x14   : > { %1534 = vmatmul.mubr.msk.bf16.vlgmr.msra.gmra.mxu0 %vm406_vm0, %v376_v9  ;;  %1542 = vmatmul.mubr.msk.bf16.vlgmr.msra.gmra.mxu1 %vm406_vm0, %v380_v17  ;;  %v382_v25 = vpack.c.bf16 %v374_v24, %v373_v23  ;;  %v1619_v34 = vld [vmem:[%s2312_s5 + $0x8] sm:$0xff]  }
  0x15   : > { %1537 = vmatprep.mubr.msk.bf16.mxu0 %vm406_vm0, %v377_v10  ;;  %1545 = vmatprep.mubr.msk.bf16.mxu1 %vm406_vm0, %v381_v21 }
  0x16   : > { %1550 = vmatpush3.bf16.msra.mxu1 %v1613_v26  ;;  %1060 = vrot.lane.b32.xlu0 %v1818_v36, %s1697_s10 }
  0x17   : > { %1551 = vmatprep.subr.bf16.mxu1 %v1614_v27  ;;  %1574 = vmatpush3.bf16.msra.mxu0 %v1617_v31 }
  0x18   : > { %1575 = vmatprep.subr.bf16.mxu0 %v1618_v33 }
  0x1a   : > { %1552 = vmatpush3.bf16.msra.mxu1 %v1614_v27 }
  0x1b   : > { %1553 = vmatprep.subr.bf16.mxu1 %v1615_v28  ;;  %1576 = vmatpush3.bf16.msra.mxu0 %v1618_v33 }
  0x1c   : > { %1538 = vmatmul.mubr.msk.bf16.gmra.mxu0 %vm406_vm0, %v378_v22  ;;  %1546 = vmatmul.mubr.msk.bf16.gmra.mxu1 %vm406_vm0, %v382_v25 }
  0x1d   : > { %1577 = vmatprep.subr.bf16.mxu0 %v1619_v34 }
  0x1e   : > { %1554 = vmatpush3.bf16.msra.mxu1 %v1615_v28 }
  0x1f   : > { %1555 = vmatprep.subr.bf16.mxu1 %v1616_v29  ;;  %1578 = vmatpush3.bf16.msra.mxu0 %v1619_v34 }
  0x22   : > { %1556 = vmatpush3.bf16.msra.mxu1 %v1616_v29 }
  0xd4   : > { %v1535_v37 = vpop.f32.mrf.mxu0  ;;  %v1543_v41 = vpop.f32.mrf.mxu1 }
  0xd5   : > { %v474_v45 = vadd.f32 %v1535_v37, %v1455_v38  ;;  %v506_v63 = vadd.f32 %v1543_v41, %v1455_v38  ;;  %v1620_v37 = vld [vmem:[%s2312_s5] sm:$0xff]   ;;  %v1864_v41 = vld [vmem:[%s1848_s24 + $0x18] sm:$0xff] }
  0xd6   : > { %v465_v39 = vpop.f32.mrf.mxu0  ;;  %v497_v44 = vpop.f32.mrf.mxu1  ;;  %1579 = vmatprep.subr.bf16.mxu0 %v1620_v37 }
  0xd7   : > { %v466_v40 = vadd.f32 %v1455_v38, %v465_v39  ;;  %v498_v50 = vadd.f32 %v1455_v38, %v497_v44  ;;  %1580 = vmatpush3.bf16.msra.mxu0 %v1620_v37  ;;  %v1854_v39 = vld [vmem:[%s1848_s24] sm:$0xff]  ;;  %v1881_v44 = vld [vmem:[%s1848_s24 + $0x30] sm:$0xff] }
  0xd8   : > { %v1536_v42 = vpop.f32.mrf.mxu0  ;;  %v1544_v48 = vpop.f32.mrf.mxu1  ;;  %942 = vrot.lane.b32.xlu0 %v1854_v39, %s1698_s25 }
  0xd9   : > { %v477_v43 = vadd.f32 %v1536_v42, %v1455_v38  ;;  %1621 = vtanh.f32 %v466_v40  ;;  %v509_v4 = vadd.f32 %v1544_v48, %v1455_v38  ;;  %v1861_v40 = vld [vmem:[%s1848_s24 + $0x10] sm:$0xff]  ;;  %v1871_v42 = vld [vmem:[%s1848_s24 + $0x20] sm:$0xff] }
  0xda   : > { %v468_v46 = vpop.f32.mrf.mxu0  ;;  %v500_v51 = vpop.f32.mrf.mxu1  ;;  %v1901_v48 = vld [vmem:[%s1848_s24 + $0x50] sm:$0xff] }
  0xdb   : > { %v469_v47 = vadd.f32 %v1455_v38, %v468_v46  ;;  %1623 = vtanh.f32 %v477_v43  ;;  %v501_v53 = vadd.f32 %v1455_v38, %v500_v51  ;;  %v1874_v43 = vld [vmem:[%s1848_s24 + $0x28] sm:$0xff]  ;;  %v1891_v46 = vld [vmem:[%s1848_s24 + $0x40] sm:$0xff]  ;;  %v1022_v51 = vmul.f32 -0.5, %v1854_v39 }
  0xdc   : > { %v1539_v49 = vpop.f32.mrf.mxu0  ;;  %v1547_v55 = vpop.f32.mrf.mxu1  ;;  %948 = vrot.lane.b32.xlu0 %v1864_v41, %s1698_s25 }
  0xdd   : > { %1625 = vtanh.f32 %v469_v47  ;;  %v490_v59 = vadd.f32 %v1539_v49, %v1455_v38  ;;  %v522_v12 = vadd.f32 %v1547_v55, %v1455_v38  ;;  %v1894_v47 = vld [vmem:[%s1848_s24 + $0x48] sm:$0xff]  ;;  %v1904_v49 = vld [vmem:[%s1848_s24 + $0x58] sm:$0xff]  ;;  %v1024_v55 = vmul.f32 -0.5, %v1861_v40 }
  0xde   : > { %1627 = vtanh.f32 %v474_v45  ;;  %v481_v52 = vpop.f32.mrf.mxu0  ;;  %v513_v58 = vpop.f32.mrf.mxu1  ;;  %v1884_v45 = vld [vmem:[%s1848_s24 + $0x38] sm:$0xff] }
  0xdf   : > { %v482_v54 = vadd.f32 %v1455_v38, %v481_v52  ;;  %1629 = vtanh.f32 %v498_v50  ;;  %v514_v1 = vadd.f32 %v1455_v38, %v513_v58  ;;  %v1913_v52 = vld [vmem:[%s1848_s24 + $0x60] sm:$0xff]  ;;  %v1927_v58 = vld [vmem:[%s1848_s24 + $0x70] sm:$0xff] }
  0xe0   : > { %v1540_v56 = vpop.f32.mrf.mxu0  ;;  %1631 = vtanh.f32 %v501_v53  ;;  %v1548_v62 = vpop.f32.mrf.mxu1  ;;  %952 = vrot.lane.b32.xlu0 %v1874_v43, %s1698_s25  ;;  %v1916_v53 = vld [vmem:[%s1848_s24 + $0x68] sm:$0xff] }
  0xe1   : > { %v493_v57 = vadd.f32 %v1540_v56, %v1455_v38  ;;  %1633 = vtanh.f32 %v482_v54  ;;  %v525_v14 = vadd.f32 %v1548_v62, %v1455_v38  ;;  %v1025_v54 = vmul.f32 -0.5, %v1864_v41 }
  0xe2   : > { %v484_v60 = vpop.f32.mrf.mxu0  ;;  %v516_v0 = vpop.f32.mrf.mxu1 }
  0xe3   : > { %v485_v61 = vadd.f32 %v1455_v38, %v484_v60  ;;  %1635 = vtanh.f32 %v493_v57  ;;  %v517_v2 = vadd.f32 %v1455_v38, %v516_v0  ;;  %v1851_v38 = vld [vmem:[%s1848_s24 + $0x8] sm:$0xff]  ;;  %v1038_v57 = vmul.f32 %v1022_v51, %v1854_v39  ;;  %v1061_v60 = vpop.permute.xlu0 %1060 }
  0xe4   : > { %944 = vrot.lane.b32.xlu1 %v1851_v38, %s1698_s25  ;;  %956 = vrot.lane.b32.xlu0 %v1884_v45, %s1698_s25  ;;  %v1023_v50 = vmul.f32 -0.5, %v1851_v38  ;;  %v1041_v62 = vmul.f32 %v1025_v54, %v1864_v41 }
  0xe5   : > { %1637 = vtanh.f32 %v485_v61  ;;  %v1026_v61 = vmul.f32 -0.5, %v1871_v42 }
  0xe6   : > { %1639 = vtanh.f32 %v490_v59  ;;  %v1622_v3 = vpop.eup %1621  ;;  %v1039_v56 = vmul.f32 %v1023_v50, %v1851_v38  ;;  %v1930_v59 = vld [vmem:[%s1848_s24 + $0x78] sm:$0xff] }
  0xe7   : > { %1641 = vtanh.f32 %v506_v63  ;;  %v1027_v63 = vmul.f32 -0.5, %v1874_v43 }
  0xe8   : > { %v1624_v5 = vpop.eup %1623  ;;  %1643 = vtanh.f32 %v514_v1  ;;  %946 = vrot.lane.b32.xlu1 %v1861_v40, %s1698_s25  ;;  %960 = vrot.lane.b32.xlu0 %v1894_v47, %s1698_s25  ;;  %v1064_v0 = vadd.f32 %v1061_v60, %v1039_v56  ;;  %v1063_v1 = vadd.f32 %v1061_v60, %v1038_v57 }
  0xe9   : > { %1645 = vtanh.f32 %v517_v2  ;;  %v1040_v2 = vmul.f32 %v1024_v55, %v1861_v40 }
  0xea   : > { %v1626_v6 = vpop.eup %1625  ;;  %1647 = vtanh.f32 %v509_v4  ;;  %v1066_v4 = vadd.f32 %v1061_v60, %v1041_v62 }
  0xeb   : > { %v1628_v7 = vpop.eup %1627  ;;  %v544_v8 = vpack.c.bf16 %v1626_v6, %v1622_v3  ;;  %1649 = vtanh.f32 %v522_v12  ;;  %v1029_v3 = vmul.f32 -0.5, %v1884_v45  ;;  %v1065_v6 = vadd.f32 %v1061_v60, %v1040_v2 }
  0xec   : > { %v545_v9 = vpack.c.bf16 %v1624_v5, %v1628_v7  ;;  %v1630_v10 = vpop.eup %1629  ;;  %1651 = vtanh.f32 %v525_v14  ;;  %950 = vrot.lane.b32.xlu1 %v1871_v42, %s1698_s25  ;;  %964 = vrot.lane.b32.xlu0 %v1904_v49, %s1698_s25  ;;  %v1028_v5 = vmul.f32 -0.5, %v1881_v44  ;;  %v1043_v7 = vmul.f32 %v1027_v63, %v1874_v43 }
  0xed   : > { %1557 = vmatprep.mubr.msk.bf16.mxu1 %vm591_vm1, %v544_v8  ;;  %v1632_v11 = vpop.eup %1631  ;;  %v1042_v8 = vmul.f32 %v1026_v61, %v1871_v42  ;;  %v1981_v61 = vld [vmem:[%s2311_s4] ss:$0 sm:$0xff] }
  0xee   : > { %1558 = vmatmul.mubr.msk.bf16.vlgmr.msra.gmra.mxu1 %vm591_vm1, %v545_v9  ;;  %v1634_v13 = vpop.eup %1633  ;;  %v548_v19 = vpack.c.bf16 %v1632_v11, %v1630_v10  ;;  %v1031_v9 = vmul.f32 -0.5, %v1894_v47  ;;  %v1045_v10 = vmul.f32 %v1029_v3, %v1884_v45  ;;  %v1030_v11 = vmul.f32 -0.5, %v1891_v46 }
  0xef   : > { %v1068_v12 = vadd.f32 %v1061_v60, %v1043_v7  ;;  %v1044_v14 = vmul.f32 %v1028_v5, %v1881_v44 }
  0xf0   : > { %v1636_v15 = vpop.eup %1635  ;;  %954 = vrot.lane.b32.xlu1 %v1881_v44, %s1698_s25  ;;  %968 = vrot.lane.b32.xlu0 %v1916_v53, %s1698_s25 }
  0xf2   : > { %v1638_v16 = vpop.eup %1637 }
  0xf3   : > { %v1640_v17 = vpop.eup %1639  ;;  %v546_v18 = vpack.c.bf16 %v1638_v16, %v1634_v13  ;;  %v1067_v13 = vadd.f32 %v1061_v60, %v1042_v8  ;;  %v1047_v16 = vmul.f32 %v1031_v9, %v1894_v47 }
  0xf4   : > { %v547_v20 = vpack.c.bf16 %v1636_v15, %v1640_v17  ;;  %v1642_v21 = vpop.eup %1641  ;;  %958 = vrot.lane.b32.xlu1 %v1891_v46, %s1698_s25  ;;  %972 = vrot.lane.b32.xlu0 %v1930_v59, %s1698_s25  ;;  %v1033_v15 = vmul.f32 -0.5, %v1904_v49  ;;  %v1032_v17 = vmul.f32 -0.5, %v1901_v48 }
  0xf5   : > { %1561 = vmatprep.mubr.msk.bf16.mxu1 %vm591_vm1, %v546_v18  ;;  %v1644_v22 = vpop.eup %1643  ;;  %v1070_v18 = vadd.f32 %v1061_v60, %v1045_v10 }
  0xf6   : > { %1562 = vmatmul.mubr.msk.bf16.gmra.mxu1 %vm591_vm1, %v547_v20  ;;  %v1646_v23 = vpop.eup %1645  ;;  %v1046_v20 = vmul.f32 %v1030_v11, %v1891_v46 }
  0xf7   : > { %1565 = vmatprep.mubr.msk.bf16.mxu1 %vm591_vm1, %v548_v19  ;;  %v1648_v24 = vpop.eup %1647  ;;  %v550_v25 = vpack.c.bf16 %v1646_v23, %v1644_v22  ;;  %v1069_v19 = vadd.f32 %v1061_v60, %v1044_v14  ;;  %v1049_v22 = vmul.f32 %v1033_v15, %v1904_v49  ;;  %v1035_v23 = vmul.f32 -0.5, %v1916_v53 }
  0xf8   : > { %v549_v26 = vpack.c.bf16 %v1648_v24, %v1642_v21  ;;  %v1650_v27 = vpop.eup %1649  ;;  %962 = vrot.lane.b32.xlu1 %v1901_v48, %s1698_s25  ;;  %1095 = vrot.lane.b32.xlu0 %v1063_v1, %s1698_s25  ;;  %v1034_v21 = vmul.f32 -0.5, %v1913_v52  ;;  %v1072_v24 = vadd.f32 %v1061_v60, %v1047_v16 }
  0xf9   : > { %v1652_v28 = vpop.eup %1651  ;;  %v1051_v33 = vmul.f32 %v1035_v23, %v1916_v53 }
  0xfa   : > { %v551_v29 = vpack.c.bf16 %v1652_v28, %v1650_v27  ;;  %v1037_v27 = vmul.f32 -0.5, %v1930_v59  ;;  %v1074_v28 = vadd.f32 %v1061_v60, %v1049_v22  ;;  %v1050_v34 = vmul.f32 %v1034_v21, %v1913_v52 }
  0xfb   : > { %v1076_v50 = vadd.f32 %v1061_v60, %v1051_v33 }
  0xfc   : > { %966 = vrot.lane.b32.xlu1 %v1913_v52, %s1698_s25  ;;  %1099 = vrot.lane.b32.xlu0 %v1065_v6, %s1698_s25  ;;  %v1053_v37 = vmul.f32 %v1037_v27, %v1930_v59  ;;  %v1075_v51 = vadd.f32 %v1061_v60, %v1050_v34 }
  0xfe   : > { %1566 = vmatmul.mubr.msk.bf16.gmra.mxu1 %vm591_vm1, %v549_v26  ;;  %v1048_v26 = vmul.f32 %v1032_v17, %v1901_v48  ;;  %v1078_v55 = vadd.f32 %v1061_v60, %v1053_v37 }
  0xff   : > { %1569 = vmatprep.mubr.msk.bf16.mxu1 %vm591_vm1, %v550_v25  ;;  %v1071_v25 = vadd.f32 %v1061_v60, %v1046_v20 }
 0x100   : > { %970 = vrot.lane.b32.xlu1 %v1927_v58, %s1698_s25  ;;  %1103 = vrot.lane.b32.xlu0 %v1067_v13, %s1698_s25  ;;  %v1073_v31 = vadd.f32 %v1061_v60, %v1048_v26 }
 0x104   : > { %1097 = vrot.lane.b32.xlu1 %v1064_v0, %s1698_s25  ;;  %1107 = vrot.lane.b32.xlu0 %v1069_v19, %s1698_s25 }
 0x106   : > { %1570 = vmatmul.mubr.msk.bf16.gmra.mxu1 %vm591_vm1, %v551_v29  ;;  %v1036_v29 = vmul.f32 -0.5, %v1927_v58 }
 0x108   : > { %1101 = vrot.lane.b32.xlu1 %v1066_v4, %s1698_s25  ;;  %1111 = vrot.lane.b32.xlu0 %v1071_v25, %s1698_s25  ;;  %v1052_v54 = vmul.f32 %v1036_v29, %v1927_v58 }
 0x10a   : > { %v1077_v56 = vadd.f32 %v1061_v60, %v1052_v54 }
 0x10c   : > { %1105 = vrot.lane.b32.xlu1 %v1068_v12, %s1698_s25  ;;  %1115 = vrot.lane.b32.xlu0 %v1073_v31, %s1698_s25 }
 0x110   : > { %1109 = vrot.lane.b32.xlu1 %v1070_v18, %s1698_s25  ;;  %1119 = vrot.lane.b32.xlu0 %v1075_v51, %s1698_s25 }
 0x114   : > { %1113 = vrot.lane.b32.xlu1 %v1072_v24, %s1698_s25  ;;  %1123 = vrot.lane.b32.xlu0 %v1077_v56, %s1698_s25 }
 0x118   : > { %1117 = vrot.lane.b32.xlu1 %v1074_v28, %s1698_s25 }
 0x11c   : > { %1121 = vrot.lane.b32.xlu1 %v1076_v50, %s1698_s25 }
 0x120   : > { %1125 = vrot.lane.b32.xlu1 %v1078_v55, %s1698_s25 }
 0x14a   : > { %v1993_v14 = vpop.permute.xlu0 %942 }
 0x14e   : > { %v1999_v22 = vpop.permute.xlu0 %948 }
 0x152   : > { %v2006_v34 = vpop.permute.xlu0 %952 }
 0x156   : > { %v1991_v13 = vpop.permute.xlu1 %944 }
 0x15a   : > { %v1996_v19 = vpop.permute.xlu1 %946 }
 0x15e   : > { %v2003_v33 = vpop.permute.xlu1 %950 }
 0x162   : > { %v2010_v55 = vpop.permute.xlu1 %954 }
 0x1ae   : > { %v1559_v57 = vpop.f32.mrf.mxu1 }
 0x1af   : > { %v659_v2 = vadd.f32 %v1559_v57, %v1981_v61 }
 0x1b0   : > { %v650_v62 = vpop.f32.mrf.mxu1 }
 0x1b1   : > { %v651_v63 = vadd.f32 %v1981_v61, %v650_v62  ;;  %v2013_v62 = vpop.permute.xlu0 %956 }
 0x1b2   : > { %v1560_v0 = vpop.f32.mrf.mxu1 }
 0x1b3   : > { %v662_v1 = vadd.f32 %v1560_v0, %v1981_v61  ;;  %1653 = vtanh.f32 %v651_v63 }
 0x1b4   : > { %v653_v3 = vpop.f32.mrf.mxu1 }
 0x1b5   : > { %v654_v60 = vadd.f32 %v1981_v61, %v653_v3  ;;  %1655 = vtanh.f32 %v662_v1 }
 0x1b6   : > { %v1563_v4 = vpop.f32.mrf.mxu1 }
 0x1b7   : > { %1657 = vtanh.f32 %v654_v60  ;;  %v675_v9 = vadd.f32 %v1563_v4, %v1981_v61 }
 0x1b8   : > { %1659 = vtanh.f32 %v659_v2  ;;  %v666_v5 = vpop.f32.mrf.mxu1 }
 0x1b9   : > { %v667_v6 = vadd.f32 %v1981_v61, %v666_v5  ;;  %v2017_v5 = vpop.permute.xlu1 %958 }
 0x1ba   : > { %v1564_v7 = vpop.f32.mrf.mxu1 }
 0x1bb   : > { %v678_v8 = vadd.f32 %v1564_v7, %v1981_v61  ;;  %1661 = vtanh.f32 %v667_v6  ;;  %v2020_v6 = vpop.permute.xlu0 %960 }
 0x1bc   : > { %v669_v10 = vpop.f32.mrf.mxu1 }
 0x1bd   : > { %v670_v11 = vadd.f32 %v1981_v61, %v669_v10  ;;  %1663 = vtanh.f32 %v678_v8  ;;  %v2023_v8 = vpop.permute.xlu1 %962 }
 0x1be   : > { %v1567_v12 = vpop.f32.mrf.mxu1 }
 0x1bf   : > { %1665 = vtanh.f32 %v670_v11  ;;  %v691_v24 = vadd.f32 %v1567_v12, %v1981_v61  ;;  %v2025_v10 = vpop.permute.xlu0 %964 }
 0x1c0   : > { %1667 = vtanh.f32 %v675_v9  ;;  %v682_v15 = vpop.f32.mrf.mxu1  ;;  %v1654_v17 = vpop.eup %1653 }
 0x1c1   : > { %v683_v16 = vadd.f32 %v1981_v61, %v682_v15 }
 0x1c2   : > { %v1568_v18 = vpop.f32.mrf.mxu1  ;;  %v1656_v20 = vpop.eup %1655 }
 0x1c3   : > { %v694_v21 = vadd.f32 %v1568_v18, %v1981_v61  ;;  %1669 = vtanh.f32 %v683_v16  ;;  %v2027_v16 = vpop.permute.xlu1 %966 }
 0x1c4   : > { %v1658_v23 = vpop.eup %1657  ;;  %v685_v25 = vpop.f32.mrf.mxu1 }
 0x1c5   : > { %v1660_v26 = vpop.eup %1659  ;;  %v686_v27 = vadd.f32 %v1981_v61, %v685_v25  ;;  %v729_v28 = vpack.c.bf16 %v1658_v23, %v1654_v17  ;;  %1671 = vtanh.f32 %v694_v21  ;;  %v2030_v17 = vpop.permute.xlu0 %968 }
 0x1c6   : > { %v730_v29 = vpack.c.bf16 %v1656_v20, %v1660_v26  ;;  %v1571_v31 = vpop.f32.mrf.mxu1 }
 0x1c7   : > { %1673 = vtanh.f32 %v686_v27  ;;  %1581 = vmatprep.mubr.msk.bf16.mxu0 %vm591_vm1, %v729_v28  ;;  %v707_v0 = vadd.f32 %v1571_v31, %v1981_v61  ;;  %v2033_v20 = vpop.permute.xlu1 %970 }
 0x1c8   : > { %1675 = vtanh.f32 %v691_v24  ;;  %v698_v37 = vpop.f32.mrf.mxu1  ;;  %1582 = vmatmul.mubr.msk.bf16.vlgmr.msra.gmra.mxu0 %vm591_vm1, %v730_v29  ;;  %v1662_v51 = vpop.eup %1661 }
 0x1c9   : > { %v699_v50 = vadd.f32 %v1981_v61, %v698_v37  ;;  %v2035_v23 = vpop.permute.xlu0 %972 }
 0x1ca   : > { %v1572_v54 = vpop.f32.mrf.mxu1  ;;  %v1664_v56 = vpop.eup %1663 }
 0x1cb   : > { %v710_v57 = vadd.f32 %v1572_v54, %v1981_v61  ;;  %1677 = vtanh.f32 %v699_v50  ;;  %v1098_v28 = vpop.permute.xlu1 %1097 }
 0x1cc   : > { %v1666_v63 = vpop.eup %1665  ;;  %v701_v1 = vpop.f32.mrf.mxu1  ;;  %v1147_v50 = vsel %vm1143_vm2, %v1098_v28, 0.0  ;;  %v898_v28 = vmul.f32 1.442695, %v1810_v30 }
 0x1cd   : > { %v1668_v2 = vpop.eup %1667  ;;  %v702_v3 = vadd.f32 %v1981_v61, %v701_v1  ;;  %v731_v60 = vpack.c.bf16 %v1666_v63, %v1662_v51  ;;  %1679 = vtanh.f32 %v710_v57  ;;  %v1096_v29 = vpop.permute.xlu0 %1095 }
 0x1ce   : > { %v732_v4 = vpack.c.bf16 %v1664_v56, %v1668_v2  ;;  %v1144_v31 = vsel %vm1143_vm2, %v1096_v29, 0.0  ;;  %v901_v29 = vmul.f32 1.442695, %v900_v32 }
 0x1cf   : > { %1681 = vtanh.f32 %v702_v3  ;;  %1585 = vmatprep.mubr.msk.bf16.mxu0 %vm591_vm1, %v731_v60  ;;  %1145 = vadd.xlane.f32.xlu1 %v1144_v31  ;;  %v1102_v37 = vpop.permute.xlu1 %1101 }
 0x1d0   : > { %1683 = vtanh.f32 %v707_v0  ;;  %1586 = vmatmul.mubr.msk.bf16.gmra.mxu0 %vm591_vm1, %v732_v4  ;;  %v1670_v7 = vpop.eup %1669  ;;  %v1153_v57 = vsel %vm1143_vm2, %v1102_v37, 0.0 }
 0x1d1   : > { %v1100_v51 = vpop.permute.xlu0 %1099  ;;  %1685 = vpow2.f32 %v898_v28 }
 0x1d2   : > { %v1672_v9 = vpop.eup %1671  ;;  %v1150_v54 = vsel %vm1143_vm2, %v1100_v51, 0.0  ;;  %1687 = vpow2.f32 %v901_v29 }
 0x1d3   : > { %1148 = vadd.xlane.f32.xlu1 %v1147_v50  ;;  %1151 = vadd.xlane.f32.xlu0 %v1150_v54  ;;  %v1106_v56 = vpop.permute.xlu1 %1105  ;;  %v2059_v50 = vld [vmem:[%s2313_s6] ss:$0 sm:$0xff] }
 0x1d4   : > { %v1674_v61 = vpop.eup %1673  ;;  %v1159_v2 = vsel %vm1143_vm2, %v1106_v56, 0.0 }
 0x1d5   : > { %v1676_v11 = vpop.eup %1675  ;;  %v733_v12 = vpack.c.bf16 %v1674_v61, %v1670_v7  ;;  %v1104_v63 = vpop.permute.xlu0 %1103 }
 0x1d6   : > { %v734_v15 = vpack.c.bf16 %v1672_v9, %v1676_v11  ;;  %v1156_v0 = vsel %vm1143_vm2, %v1104_v63, 0.0 }
 0x1d7   : > { %1589 = vmatprep.mubr.msk.bf16.mxu0 %vm591_vm1, %v733_v12  ;;  %1154 = vadd.xlane.f32.xlu1 %v1153_v57  ;;  %v1110_v1 = vpop.permute.xlu1 %1109 }
 0x1d8   : > { %1590 = vmatmul.mubr.msk.bf16.gmra.mxu0 %vm591_vm1, %v734_v15  ;;  %v1678_v18 = vpop.eup %1677  ;;  %1157 = vadd.xlane.f32.xlu0 %v1156_v0  ;;  %v1165_v7 = vsel %vm1143_vm2, %v1110_v1, 0.0 }
 0x1d9   : > { %v1108_v3 = vpop.permute.xlu0 %1107 }
 0x1da   : > { %v1680_v21 = vpop.eup %1679  ;;  %v1162_v60 = vsel %vm1143_vm2, %v1108_v3, 0.0 }
 0x1db   : > { %1160 = vadd.xlane.f32.xlu1 %v1159_v2  ;;  %v1114_v4 = vpop.permute.xlu1 %1113 }
 0x1dc   : > { %v1682_v24 = vpop.eup %1681  ;;  %1163 = vadd.xlane.f32.xlu0 %v1162_v60  ;;  %v1171_v11 = vsel %vm1143_vm2, %v1114_v4, 0.0 }
 0x1dd   : > { %v1684_v25 = vpop.eup %1683  ;;  %v735_v26 = vpack.c.bf16 %v1682_v24, %v1678_v18  ;;  %v1112_v9 = vpop.permute.xlu0 %1111 }
 0x1de   : > { %v736_v27 = vpack.c.bf16 %v1680_v21, %v1684_v25  ;;  %v1168_v61 = vsel %vm1143_vm2, %v1112_v9, 0.0  ;;  %v1686_v31 = vpop.eup %1685 }
 0x1df   : > { %1593 = vmatprep.mubr.msk.bf16.mxu0 %vm591_vm1, %v735_v26  ;;  %1166 = vadd.xlane.f32.xlu1 %v1165_v7  ;;  %v1118_v12 = vpop.permute.xlu1 %1117  ;;  %v1688_v37 = vpop.eup %1687  ;;  %v2062_v51 = vrot.slane %v1686_v31, %v1815_v35 }
 0x1e0   : > { %1594 = vmatmul.mubr.msk.bf16.gmra.mxu0 %vm591_vm1, %v736_v27  ;;  %1169 = vadd.xlane.f32.xlu0 %v1168_v61  ;;  %v1177_v21 = vsel %vm1143_vm2, %v1118_v12, 0.0  ;;  %v2068_v30 = vrot.slane %v1688_v37, %v1815_v35 }
 0x1e1   : > { %v1116_v15 = vpop.permute.xlu0 %1115  ;;  %v992_v56 = vmul.f32 %v1996_v19, %v2062_v51  ;;  %v990_v63 = vmul.f32 %v1993_v14, %v2062_v51  ;;  %v991_v35 = vmul.f32 %v1991_v13, %v2062_v51  ;;  %v993_v2 = vmul.f32 %v1999_v22, %v2062_v51 }
 0x1e2   : > { %v1174_v18 = vsel %vm1143_vm2, %v1116_v15, 0.0  ;;  %v994_v3 = vmul.f32 %v2003_v33, %v2062_v51  ;;  %v995_v9 = vmul.f32 %v2006_v34, %v2062_v51  ;;  %v996_v13 = vmul.f32 %v2010_v55, %v2062_v51 }
 0x1e3   : > { %1172 = vadd.xlane.f32.xlu1 %v1171_v11  ;;  %v1122_v26 = vpop.permute.xlu1 %1121  ;;  %v997_v22 = vmul.f32 %v2013_v62, %v2062_v51  ;;  %v2099_v33 = vmul.f32 %v2017_v5, %v2062_v51  ;;  %v2108_v55 = vmul.f32 %v2020_v6, %v2062_v51  ;;  %v1000_v62 = vmul.f32 %v2023_v8, %v2062_v51 }
 0x1e4   : > { %1175 = vadd.xlane.f32.xlu0 %v1174_v18  ;;  %v1183_v27 = vsel %vm1143_vm2, %v1122_v26, 0.0  ;;  %v2114_v5 = vmul.f32 %v2025_v10, %v2062_v51  ;;  %v2127_v8 = vmul.f32 %v2030_v17, %v2062_v51 }
 0x1e5   : > { %v1120_v24 = vpop.permute.xlu0 %1119 }
 0x1e6   : > { %v1180_v25 = vsel %vm1143_vm2, %v1120_v24, 0.0 }
 0x1e7   : > { %1178 = vadd.xlane.f32.xlu1 %v1177_v21 }
 0x1e8   : > { %1181 = vadd.xlane.f32.xlu0 %v1180_v25  ;;  %v2123_v25 = vmul.f32 %v2027_v16, %v2062_v51  ;;  %v2136_v16 = vmul.f32 %v2033_v20, %v2062_v51 }
 0x1eb   : > { %1184 = vadd.xlane.f32.xlu1 %v1183_v27 }
 0x288   : > { %v1583_v54 = vpop.f32.mrf.mxu0 }
 0x289   : > { %v843_v57 = vadd.f32 %v1583_v54, %v2059_v50 }
 0x28a   : > { %v834_v32 = vpop.f32.mrf.mxu0 }
 0x28b   : > { %v1008_v0 = vadd.f32 %v992_v56, %v843_v57  ;;  %v1194_v1 = vsub.f32 %v1861_v40, %v843_v57  ;;  %v835_v19 = vadd.f32 %v2059_v50, %v834_v32 }
 0x28c   : > { %v1584_v60 = vpop.f32.mrf.mxu0 }
 0x28d   : > { %v1216_v4 = vmul.f32 %v2068_v30, %v1194_v1  ;;  %1328 = vst.msk [vmem:[%s2074_s12 + $0x10] sm:$0xff] %vm1143_vm2, %v1008_v0  ;;  %v1006_v14 = vadd.f32 %v990_v63, %v835_v19  ;;  %v1192_v40 = vsub.f32 %v1854_v39, %v835_v19  ;;  %v846_v7 = vadd.f32 %v1584_v60, %v2059_v50 }
 0x28e   : > { %v837_v61 = vpop.f32.mrf.mxu0 }
 0x28f   : > { %v1214_v11 = vmul.f32 %v2068_v30, %v1192_v40  ;;  %1326 = vst.msk [vmem:[%s2074_s12] sm:$0xff] %vm1143_vm2, %v1006_v14  ;;  %v1009_v39 = vadd.f32 %v993_v2, %v846_v7  ;;  %v1195_v12 = vsub.f32 %v1864_v41, %v846_v7  ;;  %v838_v34 = vadd.f32 %v2059_v50, %v837_v61 }
 0x290   : > { %v1587_v15 = vpop.f32.mrf.mxu0  ;;  %v1232_v18 = vmul.f32 -0.5, %v1216_v4 }
 0x291   : > { %v1217_v21 = vmul.f32 %v2068_v30, %v1195_v12  ;;  %1329 = vst.msk [vmem:[%s2074_s12 + $0x18] sm:$0xff] %vm1143_vm2, %v1009_v39  ;;  %v1007_v41 = vadd.f32 %v991_v35, %v838_v34  ;;  %v1193_v24 = vsub.f32 %v1851_v38, %v838_v34  ;;  %v859_v6 = vadd.f32 %v1587_v15, %v2059_v50 }
 0x292   : > { %v850_v10 = vpop.f32.mrf.mxu0  ;;  %v1248_v26 = vmul.f32 %v1232_v18, %v1216_v4  ;;  %v1230_v27 = vmul.f32 -0.5, %v1214_v11  ;;  %v2160_v39 = vmul.f32 %v2035_v23, %v2062_v51 }
 0x293   : > { %v1215_v28 = vmul.f32 %v2068_v30, %v1193_v24  ;;  %1327 = vst.msk [vmem:[%s2074_s12 + $0x8] sm:$0xff] %vm1143_vm2, %v1007_v41  ;;  %v1012_v29 = vadd.f32 %v996_v13, %v859_v6  ;;  %v1198_v38 = vsub.f32 %v1881_v44, %v859_v6  ;;  %v851_v31 = vadd.f32 %v2059_v50, %v850_v10 }
 0x294   : > { %v1588_v37 = vpop.f32.mrf.mxu0  ;;  %v1264_v17 = vadd.f32 %v1248_v26, %v1818_v36  ;;  %v1246_v54 = vmul.f32 %v1230_v27, %v1214_v11  ;;  %v1233_v56 = vmul.f32 -0.5, %v1217_v21 }
 0x295   : > { %v1220_v57 = vmul.f32 %v2068_v30, %v1198_v38  ;;  %1332 = vst.msk [vmem:[%s2074_s12 + $0x30] sm:$0xff] %vm1143_vm2, %v1012_v29  ;;  %v1010_v32 = vadd.f32 %v994_v3, %v851_v31  ;;  %v1196_v63 = vsub.f32 %v1871_v42, %v851_v31  ;;  %v862_v44 = vadd.f32 %v1588_v37, %v2059_v50 }
 0x296   : > { %v1284_v0 = vsel %vm1143_vm2, %v1264_v17, 0.0  ;;  %v853_v1 = vpop.f32.mrf.mxu0  ;;  %v1262_v20 = vadd.f32 %v1246_v54, %v1818_v36  ;;  %v1249_v19 = vmul.f32 %v1233_v56, %v1217_v21  ;;  %v1231_v35 = vmul.f32 -0.5, %v1215_v28 }
 0x297   : > { %v1218_v2 = vmul.f32 %v2068_v30, %v1196_v63  ;;  %1330 = vst.msk [vmem:[%s2074_s12 + $0x20] sm:$0xff] %vm1143_vm2, %v1010_v32  ;;  %v1013_v60 = vadd.f32 %v997_v22, %v862_v44  ;;  %v1199_v4 = vsub.f32 %v1884_v45, %v862_v44  ;;  %1285 = vadd.xlane.f32.xlu1 %v1284_v0  ;;  %v1236_v7 = vmul.f32 -0.5, %v1220_v57 }
 0x298   : > { %v854_v42 = vadd.f32 %v2059_v50, %v853_v1  ;;  %v1591_v3 = vpop.f32.mrf.mxu0  ;;  %v1278_v14 = vsel %vm1143_vm2, %v1262_v20, 0.0  ;;  %v1265_v40 = vadd.f32 %v1249_v19, %v1818_v36  ;;  %v1247_v13 = vmul.f32 %v1231_v35, %v1215_v28 }
 0x299   : > { %v1221_v61 = vmul.f32 %v2068_v30, %v1199_v4  ;;  %1333 = vst.msk [vmem:[%s2074_s12 + $0x38] sm:$0xff] %vm1143_vm2, %v1013_v60  ;;  %v875_v45 = vadd.f32 %v1591_v3, %v2059_v50  ;;  %1279 = vadd.xlane.f32.xlu0 %v1278_v14  ;;  %v1252_v15 = vmul.f32 %v1236_v7, %v1220_v57  ;;  %v1234_v18 = vmul.f32 -0.5, %v1218_v2 }
 0x29a   : > { %v1011_v11 = vadd.f32 %v995_v9, %v854_v42  ;;  %v1197_v22 = vsub.f32 %v1874_v43, %v854_v42  ;;  %v866_v12 = vpop.f32.mrf.mxu0  ;;  %v1287_v34 = vsel %vm1143_vm2, %v1265_v40, 0.0  ;;  %v1263_v23 = vadd.f32 %v1247_v13, %v1818_v36 }
 0x29b   : > { %v1016_v9 = vadd.f32 %v1000_v62, %v875_v45  ;;  %v1202_v43 = vsub.f32 %v1901_v48, %v875_v45  ;;  %v867_v41 = vadd.f32 %v2059_v50, %v866_v12  ;;  %v1268_v6 = vadd.f32 %v1252_v15, %v1818_v36 }
 0x29c   : > { %v1219_v21 = vmul.f32 %v2068_v30, %v1197_v22  ;;  %1331 = vst.msk [vmem:[%s2074_s12 + $0x28] sm:$0xff] %vm1143_vm2, %v1011_v11  ;;  %v1592_v24 = vpop.f32.mrf.mxu0  ;;  %v1250_v51 = vmul.f32 %v1234_v18, %v1218_v2  ;;  %v1237_v10 = vmul.f32 -0.5, %v1221_v61  ;;  %v1281_v57 = vsel %vm1143_vm2, %v1263_v23, 0.0 }
 0x29d   : > { %v1224_v26 = vmul.f32 %v2068_v30, %v1202_v43  ;;  %1336 = vst.msk [vmem:[%s2074_s12 + $0x50] sm:$0xff] %vm1143_vm2, %v1016_v9  ;;  %v1014_v27 = vadd.f32 %v2099_v33, %v867_v41  ;;  %v1200_v62 = vsub.f32 %v1891_v46, %v867_v41  ;;  %v878_v48 = vadd.f32 %v1592_v24, %v2059_v50 }
 0x29e   : > { %1288 = vadd.xlane.f32.xlu0 %v1287_v34  ;;  %v1296_v28 = vsel %vm1143_vm2, %v1268_v6, 0.0  ;;  %v869_v29 = vpop.f32.mrf.mxu0  ;;  %v1266_v38 = vadd.f32 %v1250_v51, %v1818_v36  ;;  %v1253_v31 = vmul.f32 %v1237_v10, %v1221_v61  ;;  %v1235_v37 = vmul.f32 -0.5, %v1219_v21 }
 0x29f   : > { %v1222_v17 = vmul.f32 %v2068_v30, %v1200_v62  ;;  %1334 = vst.msk [vmem:[%s2074_s12 + $0x40] sm:$0xff] %vm1143_vm2, %v1014_v27  ;;  %v1017_v54 = vadd.f32 %v2114_v5, %v878_v48  ;;  %v1203_v33 = vsub.f32 %v1904_v49, %v878_v48  ;;  %1297 = vadd.xlane.f32.xlu1 %v1296_v28  ;;  %v1240_v63 = vmul.f32 -0.5, %v1224_v26 }
 0x2a0   : > { %v870_v46 = vadd.f32 %v2059_v50, %v869_v29  ;;  %v1595_v56 = vpop.f32.mrf.mxu0  ;;  %v1269_v32 = vadd.f32 %v1253_v31, %v1818_v36  ;;  %v1251_v44 = vmul.f32 %v1235_v37, %v1219_v21  ;;  %v1290_v19 = vsel %vm1143_vm2, %v1266_v38, 0.0 }
 0x2a1   : > { %v1225_v0 = vmul.f32 %v2068_v30, %v1203_v33  ;;  %1337 = vst.msk [vmem:[%s2074_s12 + $0x58] sm:$0xff] %vm1143_vm2, %v1017_v54  ;;  %v891_v49 = vadd.f32 %v1595_v56, %v2059_v50  ;;  %v1256_v2 = vmul.f32 %v1240_v63, %v1224_v26  ;;  %v1238_v60 = vmul.f32 -0.5, %v1222_v17  ;;  %v1126_v54 = vpop.permute.xlu1 %1125 }
 0x2a2   : > { %v1015_v1 = vadd.f32 %v2108_v55, %v870_v46  ;;  %v1201_v5 = vsub.f32 %v1894_v47, %v870_v46  ;;  %1282 = vadd.xlane.f32.xlu0 %v1281_v57  ;;  %v882_v20 = vpop.f32.mrf.mxu0  ;;  %v1299_v35 = vsel %vm1143_vm2, %v1269_v32, 0.0  ;;  %v1267_v40 = vadd.f32 %v1251_v44, %v1818_v36  ;;  %v1124_v32 = vpop.permute.xlu0 %1123 }
 0x2a3   : > { %v1020_v42 = vadd.f32 %v2136_v16, %v891_v49  ;;  %v1206_v55 = vsub.f32 %v1927_v58, %v891_v49  ;;  %v883_v47 = vadd.f32 %v2059_v50, %v882_v20  ;;  %1291 = vadd.xlane.f32.xlu1 %v1290_v19  ;;  %v1272_v14 = vadd.f32 %v1256_v2, %v1818_v36 }
 0x2a4   : > { %v1223_v4 = vmul.f32 %v2068_v30, %v1201_v5  ;;  %1335 = vst.msk [vmem:[%s2074_s12 + $0x48] sm:$0xff] %vm1143_vm2, %v1015_v1  ;;  %v1596_v3 = vpop.f32.mrf.mxu0  ;;  %v1254_v7 = vmul.f32 %v1238_v60, %v1222_v17  ;;  %v1241_v13 = vmul.f32 -0.5, %v1225_v0  ;;  %v1293_v9 = vsel %vm1143_vm2, %v1267_v40, 0.0 }
 0x2a5   : > { %v1228_v61 = vmul.f32 %v2068_v30, %v1206_v55  ;;  %1340 = vst.msk [vmem:[%s2074_s12 + $0x70] sm:$0xff] %vm1143_vm2, %v1020_v42  ;;  %v1018_v11 = vadd.f32 %v2123_v25, %v883_v47  ;;  %v1204_v16 = vsub.f32 %v1913_v52, %v883_v47  ;;  %v894_v58 = vadd.f32 %v1596_v3, %v2059_v50  ;;  %v1146_v44 = vpop.xlane.xlu1 %1145 }
 0x2a6   : > { %1300 = vadd.xlane.f32.xlu0 %v1299_v35  ;;  %v885_v22 = vpop.f32.mrf.mxu0  ;;  %v1308_v45 = vsel %vm1143_vm2, %v1272_v14, 0.0  ;;  %v1270_v12 = vadd.f32 %v1254_v7, %v1818_v36  ;;  %v1257_v34 = vmul.f32 %v1241_v13, %v1225_v0  ;;  %v1239_v15 = vmul.f32 -0.5, %v1223_v4  ;;  %v1152_v5 = vpop.xlane.xlu0 %1151 }
 0x2a7   : > { %v1226_v18 = vmul.f32 %v2068_v30, %v1204_v16  ;;  %1338 = vst.msk [vmem:[%s2074_s12 + $0x60] sm:$0xff] %vm1143_vm2, %v1018_v11  ;;  %v1021_v21 = vadd.f32 %v2160_v39, %v894_v58  ;;  %v1207_v25 = vsub.f32 %v1930_v59, %v894_v58  ;;  %v886_v52 = vadd.f32 %v2059_v50, %v885_v22 }
 0x2a8   : > { %1309 = vadd.xlane.f32.xlu1 %v1308_v45  ;;  %v1273_v43 = vadd.f32 %v1257_v34, %v1818_v36  ;;  %v1244_v41 = vmul.f32 -0.5, %v1228_v61  ;;  %v1255_v24 = vmul.f32 %v1239_v15, %v1223_v4  ;;  %v1302_v51 = vsel %vm1143_vm2, %v1270_v12, 0.0 }
 0x2a9   : > { %v1229_v6 = vmul.f32 %v2068_v30, %v1207_v25  ;;  %1341 = vst.msk [vmem:[%s2074_s12 + $0x78] sm:$0xff] %vm1143_vm2, %v1021_v21  ;;  %v1019_v23 = vadd.f32 %v2127_v8, %v886_v52  ;;  %v1205_v39 = vsub.f32 %v1916_v53, %v886_v52  ;;  %v1242_v59 = vmul.f32 -0.5, %v1226_v18  ;;  %v1149_v0 = vpop.xlane.xlu1 %1148 }
 0x2aa   : > { %1294 = vadd.xlane.f32.xlu0 %v1293_v9  ;;  %v1260_v50 = vmul.f32 %v1244_v41, %v1228_v61  ;;  %v1311_v62 = vsel %vm1143_vm2, %v1273_v43, 0.0  ;;  %v1271_v8 = vadd.f32 %v1255_v24, %v1818_v36  ;;  %v1189_v56 = vsel %vm1143_vm2, %v1126_v54, 0.0 }
 0x2ab   : > { %v1227_v10 = vmul.f32 %v2068_v30, %v1205_v39  ;;  %1339 = vst.msk [vmem:[%s2074_s12 + $0x68] sm:$0xff] %vm1143_vm2, %v1019_v23  ;;  %v1258_v26 = vmul.f32 %v1242_v59, %v1226_v18  ;;  %v1245_v27 = vmul.f32 -0.5, %v1229_v6  ;;  %v1186_v63 = vsel %vm1143_vm2, %v1124_v32, 0.0 }
 0x2ac   : > { %1303 = vadd.xlane.f32.xlu1 %v1302_v51  ;;  %v1276_v48 = vadd.f32 %v1260_v50, %v1818_v36  ;;  %v1305_v30 = vsel %vm1143_vm2, %v1271_v8, 0.0 }
 0x2ad   : > { %v1261_v53 = vmul.f32 %v1245_v27, %v1229_v6  ;;  %v1243_v28 = vmul.f32 -0.5, %v1227_v10  ;;  %v1274_v38 = vadd.f32 %v1258_v26, %v1818_v36  ;;  %v1155_v1 = vpop.xlane.xlu1 %1154 }
 0x2ae   : > { %1312 = vadd.xlane.f32.xlu0 %v1311_v62  ;;  %v1320_v29 = vsel %vm1143_vm2, %v1276_v48, 0.0 }
 0x2af   : > { %v1277_v31 = vadd.f32 %v1261_v53, %v1818_v36  ;;  %v1259_v37 = vmul.f32 %v1243_v28, %v1227_v10  ;;  %v1314_v17 = vsel %vm1143_vm2, %v1274_v38, 0.0 }
 0x2b0   : > { %1321 = vadd.xlane.f32.xlu1 %v1320_v29 }
 0x2b1   : > { %v1323_v33 = vsel %vm1143_vm2, %v1277_v31, 0.0  ;;  %v1275_v46 = vadd.f32 %v1259_v37, %v1818_v36  ;;  %v1161_v49 = vpop.xlane.xlu1 %1160  ;;  %v1158_v36 = vpop.xlane.xlu0 %1157 }
 0x2b2   : > { %1306 = vadd.xlane.f32.xlu0 %v1305_v30 }
 0x2b3   : > { %v1317_v57 = vsel %vm1143_vm2, %v1275_v46, 0.0 }
 0x2b4   : > { %1315 = vadd.xlane.f32.xlu1 %v1314_v17 }
 0x2b5   : > { %v1167_v20 = vpop.xlane.xlu1 %1166  ;;  %v1164_v19 = vpop.xlane.xlu0 %1163 }
 0x2b6   : > { %1324 = vadd.xlane.f32.xlu0 %v1323_v33 }
 0x2b8   : > { %1190 = vadd.xlane.f32.xlu1 %v1189_v56 }
 0x2b9   : > { %v1173_v35 = vpop.xlane.xlu1 %1172  ;;  %v1170_v2 = vpop.xlane.xlu0 %1169 }
 0x2ba   : > { %1318 = vadd.xlane.f32.xlu0 %v1317_v57 }
 0x2bd   : > { %v1179_v60 = vpop.xlane.xlu1 %1178  ;;  %v1176_v4 = vpop.xlane.xlu0 %1175 }
 0x2be   : > { %1187 = vadd.xlane.f32.xlu0 %v1186_v63 }
 0x2c1   : > { %v1185_v42 = vpop.xlane.xlu1 %1184  ;;  %v1182_v55 = vpop.xlane.xlu0 %1181 }
 0x320   : > { %v1286_v47 = vpop.xlane.xlu1 %1285 }
 0x321   : > { %1345 = vst.msk [vmem:[%s2074_s12 + $0x10] sm:$0xff] %vm1342_vm3, %v1286_v47 }
 0x322   : > { %1362 = vst.msk [vmem:[%s2074_s12 + $0x10] sm:$0xff] %vm1359_vm4, %v1152_v5  ;;  %v1280_v3 = vpop.xlane.xlu0 %1279 }
 0x323   : > { %1343 = vst.msk [vmem:[%s2074_s12] sm:$0xff] %vm1342_vm3, %v1280_v3 }
 0x324   : > { %1360 = vst.msk [vmem:[%s2074_s12] sm:$0xff] %vm1359_vm4, %v1146_v44 }
 0x327   : > { %v1289_v14 = vpop.xlane.xlu0 %1288 }
 0x328   : > { %1346 = vst.msk [vmem:[%s2074_s12 + $0x18] sm:$0xff] %vm1342_vm3, %v1289_v14  ;;  %v1298_v40 = vpop.xlane.xlu1 %1297 }
 0x329   : > { %1363 = vst.msk [vmem:[%s2074_s12 + $0x18] sm:$0xff] %vm1359_vm4, %v1155_v1 }
 0x32a   : > { %1349 = vst.msk [vmem:[%s2074_s12 + $0x30] sm:$0xff] %vm1342_vm3, %v1298_v40 }
 0x32b   : > { %1366 = vst.msk [vmem:[%s2074_s12 + $0x30] sm:$0xff] %vm1359_vm4, %v1164_v19  ;;  %v1283_v7 = vpop.xlane.xlu0 %1282 }
 0x32c   : > { %1344 = vst.msk [vmem:[%s2074_s12 + $0x8] sm:$0xff] %vm1342_vm3, %v1283_v7  ;;  %v1292_v13 = vpop.xlane.xlu1 %1291 }
 0x32d   : > { %1361 = vst.msk [vmem:[%s2074_s12 + $0x8] sm:$0xff] %vm1359_vm4, %v1149_v0 }
 0x32e   : > { %1347 = vst.msk [vmem:[%s2074_s12 + $0x20] sm:$0xff] %vm1342_vm3, %v1292_v13 }
 0x32f   : > { %1364 = vst.msk [vmem:[%s2074_s12 + $0x20] sm:$0xff] %vm1359_vm4, %v1158_v36  ;;  %v1301_v61 = vpop.xlane.xlu0 %1300 }
 0x330   : > { %1350 = vst.msk [vmem:[%s2074_s12 + $0x38] sm:$0xff] %vm1342_vm3, %v1301_v61 }
 0x331   : > { %1367 = vst.msk [vmem:[%s2074_s12 + $0x38] sm:$0xff] %vm1359_vm4, %v1167_v20  ;;  %v1310_v11 = vpop.xlane.xlu1 %1309 }
 0x332   : > { %1353 = vst.msk [vmem:[%s2074_s12 + $0x50] sm:$0xff] %vm1342_vm3, %v1310_v11 }
 0x333   : > { %1370 = vst.msk [vmem:[%s2074_s12 + $0x50] sm:$0xff] %vm1359_vm4, %v1176_v4  ;;  %v1295_v16 = vpop.xlane.xlu0 %1294 }
 0x334   : > { %1348 = vst.msk [vmem:[%s2074_s12 + $0x28] sm:$0xff] %vm1342_vm3, %v1295_v16 }
 0x335   : > { %1365 = vst.msk [vmem:[%s2074_s12 + $0x28] sm:$0xff] %vm1359_vm4, %v1161_v49  ;;  %v1304_v58 = vpop.xlane.xlu1 %1303 }
 0x336   : > { %1351 = vst.msk [vmem:[%s2074_s12 + $0x40] sm:$0xff] %vm1342_vm3, %v1304_v58 }
 0x337   : > { %1368 = vst.msk [vmem:[%s2074_s12 + $0x40] sm:$0xff] %vm1359_vm4, %v1170_v2  ;;  %v1313_v22 = vpop.xlane.xlu0 %1312 }
 0x338   : > { %1354 = vst.msk [vmem:[%s2074_s12 + $0x58] sm:$0xff] %vm1342_vm3, %v1313_v22 }
 0x339   : > { %1371 = vst.msk [vmem:[%s2074_s12 + $0x58] sm:$0xff] %vm1359_vm4, %v1179_v60  ;;  %v1322_v45 = vpop.xlane.xlu1 %1321 }
 0x33a   : > { %1357 = vst.msk [vmem:[%s2074_s12 + $0x70] sm:$0xff] %vm1342_vm3, %v1322_v45 }
 0x33b   : > { %v1307_v12 = vpop.xlane.xlu0 %1306 }
 0x33c   : > { %1352 = vst.msk [vmem:[%s2074_s12 + $0x48] sm:$0xff] %vm1342_vm3, %v1307_v12 }
 0x33d   : > { %1369 = vst.msk [vmem:[%s2074_s12 + $0x48] sm:$0xff] %vm1359_vm4, %v1173_v35  ;;  %v1316_v34 = vpop.xlane.xlu1 %1315 }
 0x33e   : > { %1355 = vst.msk [vmem:[%s2074_s12 + $0x60] sm:$0xff] %vm1342_vm3, %v1316_v34 }
 0x33f   : > { %1372 = vst.msk [vmem:[%s2074_s12 + $0x60] sm:$0xff] %vm1359_vm4, %v1182_v55  ;;  %v1325_v15 = vpop.xlane.xlu0 %1324 }
 0x340   : > { %1358 = vst.msk [vmem:[%s2074_s12 + $0x78] sm:$0xff] %vm1342_vm3, %v1325_v15 }
 0x341   : > { %v1191_v18 = vpop.xlane.xlu1 %1190 }
 0x342   : > { %1375 = vst.msk [vmem:[%s2074_s12 + $0x78] sm:$0xff] %vm1359_vm4, %v1191_v18 }
 0x343   : > { %v1319_v21 = vpop.xlane.xlu0 %1318 }
 0x344   : > { %1356 = vst.msk [vmem:[%s2074_s12 + $0x68] sm:$0xff] %vm1342_vm3, %v1319_v21 }
 0x345   : > { %1373 = vst.msk [vmem:[%s2074_s12 + $0x68] sm:$0xff] %vm1359_vm4, %v1185_v42 }
 0x347   : > { %v1188_v25 = vpop.xlane.xlu0 %1187 }
 0x348   : > { %1374 = vst.msk [vmem:[%s2074_s12 + $0x70] sm:$0xff] %vm1359_vm4, %v1188_v25 }
 0x349 PF: > { %s19_s30 = sadd.s32 1, %s1695_s30  }
 0x34a   : > { %p16_p4 = scmp.ge.s32.totalorder %s19_s30, 6  }
 0x34c   :  { %18 = sbr.rel (!%p16_p4) target bundleno = 1 (0x1), region = 89 }

</bundles_post_ra>
